<compile_context>
chip_gen: v6e
topology: v6e:2x2x1
jax: 0.10.0
libtpu: 0.0.40
codegen_flags: <defaults>
</compile_context>

<pallas_src>
import math

import jax
import jax.numpy as jnp
from jax.experimental import pallas as pl
from jax.experimental.pallas import tpu as pltpu


def _round_up(n, m):
    return ((n + m - 1) // m) * m


def repadapter_kernel(x_ref, wa_ref, wb_ref, beff_ref, o_ref):
    # x tile: (TOK, C_pad) -- tokens on sublanes, channels lane-dense.
    x = x_ref[...]
    # conv_A (1x1, groups=1): (TOK, C_pad) @ (C_pad, H_pad), f32 accumulation.
    h = jnp.dot(x, wa_ref[...], preferred_element_type=jnp.float32)
    # TODO(synk): nn.Dropout(0.1) is identity in eval mode; training-time
    # stochastic dropout is intentionally not implemented here.
    h = h.astype(x.dtype)
    # conv_B (1x1, groups=G) as a dense block-diagonal matmul:
    # (TOK, H_pad) @ (H_pad, C_pad), f32 accumulation.
    y = jnp.dot(h, wb_ref[...], preferred_element_type=jnp.float32)
    # Folded bias b_eff = conv_A.bias @ Wb_dense + conv_B.bias (precomputed).
    o_ref[...] = (y + beff_ref[...]).astype(o_ref.dtype)


def rep_adapter_forward(x, wa, ba, wb_dense, bb, *, seq_tile=1024,
                        compute_dtype=None, vmem_budget_bytes=40 << 20):
    """RepAdapter forward.

    x:        (B, N, C_in)  activations (tokens-major).
    wa:       (C_in, H)     conv_A weight laid out for x @ wa.
    ba:       (1, H)        conv_A bias.
    wb_dense: (H, C_in)     conv_B grouped weight expanded to block-diagonal.
    bb:       (1, C_in)     conv_B bias.
    compute_dtype: optional (e.g. jnp.bfloat16) to halve HBM traffic; the
                   output keeps x.dtype and MXU accumulation stays f32.
    """
    B, N, C = x.shape
    H = wa.shape[1]
    M = B * N
    dtype = compute_dtype or x.dtype
    out_dtype = x.dtype
    itemsize = jnp.dtype(dtype).itemsize

    # Lane-dense channel layout: pad C and H to multiples of 128 with zeros
    # (zero channels contribute nothing and are sliced off at the end).
    C_pad = _round_up(C, 128)
    H_pad = _round_up(H, 128)

    # Fold both biases: y = (x@Wa + ba)@Wb + bb = x@Wa@Wb + (ba@Wb + bb).
    b_eff = (ba.astype(jnp.float32) @ wb_dense.astype(jnp.float32)
             + bb.astype(jnp.float32))                                # (1, C)

    wa_p = jnp.zeros((C_pad, H_pad), dtype).at[:C, :H].set(wa.astype(dtype))
    wb_p = jnp.zeros((H_pad, C_pad), dtype).at[:H, :C].set(wb_dense.astype(dtype))
    beff_p = jnp.zeros((1, C_pad), jnp.float32).at[:, :C].set(b_eff)

    # Token tiling: biggest tile fitting the VMEM budget. Double-buffered
    # in + out tiles cost ~ 4 * tile * C_pad * itemsize bytes.
    max_tile = max(8, (vmem_budget_bytes // (4 * C_pad * itemsize)) // 8 * 8)
    tile = max(8, min(seq_tile, max_tile, _round_up(M, 8)))
    M_pad = _round_up(M, tile)
    grid = M_pad // tile
    # (v7x note: at realistic M the grid has many steps, so both TensorCores
    #  get balanced work under dimension_semantics=("parallel",).)

    x2 = jnp.zeros((M_pad, C_pad), dtype).at[:M, :C].set(
        x.reshape(M, C).astype(dtype))

    weight_bytes = (C_pad * H_pad + H_pad * C_pad) * itemsize + C_pad * 4
    vmem_limit = int(min(
        max(4 * tile * C_pad * itemsize + 2 * weight_bytes + (4 << 20), 16 << 20),
        48 << 20))
    cost = pl.CostEstimate(
        flops=4 * M_pad * C_pad * H_pad,
        transcendentals=0,
        bytes_accessed=2 * M_pad * C_pad * itemsize + weight_bytes)

    out = pl.pallas_call(
        repadapter_kernel,
        out_shape=jax.ShapeDtypeStruct((M_pad, C_pad), out_dtype),
        grid_spec=pltpu.PrefetchScalarGridSpec(
            num_scalar_prefetch=0,
            grid=(grid,),
            in_specs=[
                pl.BlockSpec((tile, C_pad), lambda i: (i, 0)),    # x token tile
                pl.BlockSpec((C_pad, H_pad), lambda i: (0, 0)),   # conv_A weight (resident)
                pl.BlockSpec((H_pad, C_pad), lambda i: (0, 0)),   # conv_B block-diag weight
                pl.BlockSpec((1, C_pad), lambda i: (0, 0)),       # folded bias
            ],
            out_specs=pl.BlockSpec((tile, C_pad), lambda i: (i, 0)),
        ),
        compiler_params=pltpu.CompilerParams(
            dimension_semantics=("parallel",),
            vmem_limit_bytes=vmem_limit),
        cost_estimate=cost,
    )(x2, wa_p, wb_p, beff_p)

    return out[:M, :C].reshape(B, N, C)


def expand_grouped_weight(wb_torch, groups):
    """PyTorch Conv1d(H->C_in, groups=G) weight (C_in, H//G, 1) -> dense (H, C_in)."""
    C_in, Hg, _ = wb_torch.shape
    Cg = C_in // groups
    H = Hg * groups
    wb_dense = jnp.zeros((H, C_in), wb_torch.dtype)
    for g in range(groups):
        block = wb_torch[g * Cg:(g + 1) * Cg, :, 0].T  # (Hg, Cg)
        wb_dense = wb_dense.at[g * Hg:(g + 1) * Hg, g * Cg:(g + 1) * Cg].set(block)
    return wb_dense


def init_params(key, in_features, hidden_dim, groups, dtype=jnp.float32):
    """Mirror the PyTorch __init__ (xavier_uniform conv_A, zero conv_B/biases)."""
    bound = math.sqrt(6.0 / (in_features + hidden_dim))
    wa_torch = jax.random.uniform(
        key, (hidden_dim, in_features, 1), dtype, -bound, bound)
    wa = wa_torch[:, :, 0].T                              # (C_in, H)
    ba = jnp.zeros((1, hidden_dim), dtype)
    wb_torch = jnp.zeros((in_features, hidden_dim // groups, 1), dtype)
    wb_dense = expand_grouped_weight(wb_torch, groups)    # (H, C_in) (all zero)
    bb = jnp.zeros((1, in_features), dtype)
    return wa, ba, wb_dense, bb


def rep_adapter_ref(x, wa_torch, ba_vec, wb_torch, bb_vec, groups):
    """Plain-JAX reference implementing the grouped conv directly from the
    PyTorch-layout weights (validates the block-diagonal expansion + bias fold)."""
    h = jnp.einsum("bnc,hc->bnh", x, wa_torch[:, :, 0]) + ba_vec
    C_in, Hg, _ = wb_torch.shape
    Cg = C_in // groups
    outs = []
    for g in range(groups):
        hg = h[..., g * Hg:(g + 1) * Hg]
        wg = wb_torch[g * Cg:(g + 1) * Cg, :, 0]          # (Cg, Hg)
        outs.append(jnp.einsum("bnh,ch->bnc", hg, wg))
    y = jnp.concatenate(outs, axis=-1) + bb_vec
    return y.astype(x.dtype)


if __name__ == "__main__":
    # Small shapes consistent with the module: batch=2, seq=8, in_features=32,
    # hidden_dim=8, groups=2.
    B, N, C, H, G = 2, 8, 32, 8, 2
    key = jax.random.PRNGKey(0)
    k_x, k_wa, k_ba, k_wb, k_bb = jax.random.split(key, 5)

    x = jax.random.normal(k_x, (B, N, C), dtype=jnp.float32)

    # Randomized parameters for the sanity check (the PyTorch init zeroes
    # conv_B, which would make the grouped-conv / block-diagonal path vacuous).
    bound = math.sqrt(6.0 / (C + H))
    wa_torch = jax.random.uniform(k_wa, (H, C, 1), jnp.float32, -bound, bound)
    ba_vec = 0.1 * jax.random.normal(k_ba, (H,), dtype=jnp.float32)
    wb_torch = 0.1 * jax.random.normal(k_wb, (C, H // G, 1), dtype=jnp.float32)
    bb_vec = 0.1 * jax.random.normal(k_bb, (C,), dtype=jnp.float32)

    wa = wa_torch[:, :, 0].T                  # (C, H)
    ba = ba_vec[None, :]                      # (1, H)
    wb_dense = expand_grouped_weight(wb_torch, G)  # (H, C)
    bb = bb_vec[None, :]                      # (1, C)

    out = rep_adapter_forward(x, wa, ba, wb_dense, bb, seq_tile=1024)
    out = jax.block_until_ready(out)

    ref = rep_adapter_ref(x, wa_torch, ba_vec, wb_torch, bb_vec, G)
    assert out.shape == (B, N, C)
    assert jnp.allclose(out, ref, atol=1e-5, rtol=1e-5), \
        float(jnp.max(jnp.abs(out - ref)))

    print("KERNEL_OK")
</pallas_src>

<mosaic_0001>
module attributes {stable_mosaic.version = 11 : i64} {
  func.func @repadapter_kernel(%arg0: i32, %arg1: memref<16x128xf32, #tpu.memory_space<vmem>>, %arg2: memref<128x128xf32, #tpu.memory_space<vmem>>, %arg3: memref<128x128xf32, #tpu.memory_space<vmem>>, %arg4: memref<1x128xf32, #tpu.memory_space<vmem>>, %arg5: memref<16x128xf32, #tpu.memory_space<vmem>>) attributes {dimension_semantics = [#tpu.dimension_semantics<parallel>], iteration_bounds = array<i64: 1>, scalar_prefetch = 0 : i64, scratch_operands = 0 : i64, tpu.core_type = #tpu.core_type<tc>, window_params = [{transform_indices = @transform_0, window_bounds = array<i64: 16, 128>}, {pipeline_mode = #tpu.pipeline_mode<synchronous>, transform_indices = @transform_1, window_bounds = array<i64: 128, 128>}, {pipeline_mode = #tpu.pipeline_mode<synchronous>, transform_indices = @transform_2, window_bounds = array<i64: 128, 128>}, {pipeline_mode = #tpu.pipeline_mode<synchronous>, transform_indices = @transform_3, window_bounds = array<i64: 1, 128>}, {transform_indices = @transform_4, window_bounds = array<i64: 16, 128>}]} {
    %c0 = arith.constant 0 : index
    %c0_0 = arith.constant 0 : index
    %0 = vector.load %arg1[%c0, %c0_0] : memref<16x128xf32, #tpu.memory_space<vmem>>, vector<16x128xf32>
    %c0_1 = arith.constant 0 : index
    %c0_2 = arith.constant 0 : index
    %1 = vector.load %arg2[%c0_1, %c0_2] : memref<128x128xf32, #tpu.memory_space<vmem>>, vector<128x128xf32>
    %cst = arith.constant dense<0.000000e+00> : vector<16x128xf32>
    %2 = tpu.matmul %0, %1, %cst {dimension_numbers = #tpu.dot_dimension_numbers<[1], [0], [0], [1], [0, 0, 1, 1], [], []>} : vector<16x128xf32>, vector<128x128xf32>, vector<16x128xf32> -> vector<16x128xf32>
    %c0_3 = arith.constant 0 : index
    %c0_4 = arith.constant 0 : index
    %3 = vector.load %arg3[%c0_3, %c0_4] : memref<128x128xf32, #tpu.memory_space<vmem>>, vector<128x128xf32>
    %cst_5 = arith.constant dense<0.000000e+00> : vector<16x128xf32>
    %4 = tpu.matmul %2, %3, %cst_5 {dimension_numbers = #tpu.dot_dimension_numbers<[1], [0], [0], [1], [0, 0, 1, 1], [], []>} : vector<16x128xf32>, vector<128x128xf32>, vector<16x128xf32> -> vector<16x128xf32>
    %c0_6 = arith.constant 0 : index
    %c0_7 = arith.constant 0 : index
    %5 = vector.load %arg4[%c0_6, %c0_7] : memref<1x128xf32, #tpu.memory_space<vmem>>, vector<1x128xf32>
    %6 = vector.broadcast %5 : vector<1x128xf32> to vector<16x128xf32>
    %7 = arith.addf %4, %6 : vector<16x128xf32>
    %c0_8 = arith.constant 0 : index
    %c0_9 = arith.constant 0 : index
    %8 = vector.load %arg5[%c0_8, %c0_9] : memref<16x128xf32, #tpu.memory_space<vmem>>, vector<16x128xf32>
    tpu.vector_store %arg5[%c0_8, %c0_9], %7 {strides = array<i32>} : memref<16x128xf32, #tpu.memory_space<vmem>>, vector<16x128xf32>,
    return
  }
  func.func @transform_0(%arg0: i32) -> (i32, i32) {
    %c0_i32 = arith.constant 0 : i32
    %c0_i32_0 = arith.constant 0 : i32
    return %arg0, %c0_i32 : i32, i32
  }
  func.func @transform_1(%arg0: i32) -> (i32, i32) {
    %c0_i32 = arith.constant 0 : i32
    %c0_i32_0 = arith.constant 0 : i32
    %c0_i32_1 = arith.constant 0 : i32
    return %c0_i32, %c0_i32_0 : i32, i32
  }
  func.func @transform_2(%arg0: i32) -> (i32, i32) {
    %c0_i32 = arith.constant 0 : i32
    %c0_i32_0 = arith.constant 0 : i32
    %c0_i32_1 = arith.constant 0 : i32
    return %c0_i32, %c0_i32_0 : i32, i32
  }
  func.func @transform_3(%arg0: i32) -> (i32, i32) {
    %c0_i32 = arith.constant 0 : i32
    %c0_i32_0 = arith.constant 0 : i32
    %c0_i32_1 = arith.constant 0 : i32
    return %c0_i32, %c0_i32_0 : i32, i32
  }
  func.func @transform_4(%arg0: i32) -> (i32, i32) {
    %c0_i32 = arith.constant 0 : i32
    %c0_i32_0 = arith.constant 0 : i32
    return %arg0, %c0_i32 : i32, i32
  }
}

</mosaic_0001>

<bundles_post_ra>
// kernel: tpu_custom_call.1
= control target key start
LH: loop header
LB: loop body
LE: loop exit
PB: predicated region body
PF: predicated region fallthrough
CT: control target
= control target key end

     0   :  { %9 = vsyncpa [#allocation3], 0  ;;  %s527_s0 = inlined_call_operand.hbm [shape: f32[16,128], index: 0, kind: input, shape index: {}]   ;;  %s528_s1 = inlined_call_operand.hbm [shape: f32[128,128], index: 1, kind: input, shape index: {}]   ;;  %s529_s2 = inlined_call_operand.hbm [shape: f32[128,128], index: 2, kind: input, shape index: {}]   ;;  %s530_s3 = inlined_call_operand.vmem [shape: f32[1,128], index: 3, kind: input, shape index: {}]   ;;  %s531_s4 = inlined_call_operand.hbm [shape: f32[16,128], index: 4, kind: output, shape index: {}]  }
   0x1   :  { %10 = vsyncpa [#allocation6], 0 }
   0x2   :  { %11 = vsyncpa [#allocation4], 0  ;;  %s469_s15 = smov [#allocation5]   ;;  %s470_s17 = smov [#allocation2]  }
   0x3   :  { %s29_s16 = sshll.u32 %s469_s15, 4  ;;  %s17_s18 = sshll.u32 %s470_s17, 4  ;;  %s30_s16 = int_to_ptr.vmem [resolvable:$true] %s29_s16  ;;  %s18_s18 = int_to_ptr.vmem [resolvable:$true] %s17_s18 }
   0x4   :  { %s391_s19 = scalar_lea.vmem %s30_s16, 2048  ;;  %p396_p1 = scmp.lt.s32.totalorder %s30_s16, %s30_s16 }
   0x5   :  { %p392_p0 = scmp.ne.s32.totalorder %s30_s16, %s391_s19  ;;  %p397_p2 = scmp.lt.s32.totalorder %s391_s19, %s391_s19 }
   0x7   :  { %p398_p3 = por %p397_p2, %p396_p1 }
   0x9   :  { %p399_p4 = pnand %p398_p3, %p392_p0 }
   0xb   :  { %402 = shalt.err (!%p399_p4)
}
   0xc   :  { %s471_s20 = smov 128   ;;  %s472_s21 = smov 8  }
   0xd   :  { %35 = dma.hbm_to_vmem [thread:$0]  %s528_s1, 2048, %s30_s16, [#allocation6], %s471_s20, %s471_s20, %s472_s21  }
   0xe   :  { %s411_s24 = scalar_lea.vmem %s18_s18, 256  ;;  %p416_p6 = scmp.lt.s32.totalorder %s18_s18, %s18_s18 }
   0xf   :  { %p412_p5 = scmp.ne.s32.totalorder %s18_s18, %s411_s24  ;;  %p417_p7 = scmp.lt.s32.totalorder %s411_s24, %s411_s24 }
  0x11   :  { %p418_p8 = por %p417_p7, %p416_p6 }
  0x13   :  { %p419_p9 = pnand %p418_p8, %p412_p5 }
  0x15   :  { %422 = shalt.err (!%p419_p9)
}
  0x16   :  { %23 = dma.hbm_to_vmem [thread:$0]  %s527_s0, 256, %s18_s18, [#allocation3], %s471_s20, %s471_s20, %s472_s21  }
  0x17   :  { %s473_s27 = smov [#allocation7]  }
  0x18   :  { %s41_s28 = sshll.u32 %s473_s27, 4  ;;  %s42_s28 = int_to_ptr.vmem [resolvable:$true] %s41_s28 }
  0x19   :  { %s431_s29 = scalar_lea.vmem %s42_s28, 2048  ;;  %p436_p11 = scmp.lt.s32.totalorder %s42_s28, %s42_s28 }
  0x1a   :  { %p432_p10 = scmp.ne.s32.totalorder %s42_s28, %s431_s29  ;;  %p437_p12 = scmp.lt.s32.totalorder %s431_s29, %s431_s29 }
  0x1c   :  { %p438_p13 = por %p437_p12, %p436_p11 }
  0x1e   :  { %p439_p0 = pnand %p438_p13, %p432_p10 }
  0x20   :  { %442 = shalt.err (!%p439_p0)
}
  0x21   :  { %47 = dma.hbm_to_vmem [thread:$0]  %s529_s2, 2048, %s42_s28, [#allocation6], %s471_s20, %s471_s20, %s472_s21  }
  0x22   :  { %463 = dma.done.wait [#allocation3], 256  }
  0x23   :  { %464 = vsyncadd [#allocation3], 4294967040 }
  0x24   :  { %465 = dma.done.wait [#allocation6], 4096  }
  0x25   :  { %466 = vsyncadd [#allocation6], 4294963200  ;;  %v76_v0 = vld [vmem:[#allocation5 + $0x78] sm:$0xff]  ;;  %v75_v1 = vld [vmem:[#allocation5 + $0x70] sm:$0xff]  ;;  %s474_s5 = smov [#allocation8]  }
  0x26   :  { %307 = vmatprep.subr.mxu0 %v76_v0  ;;  %v74_v2 = vld [vmem:[#allocation5 + $0x68] sm:$0xff]  ;;  %v73_v3 = vld [vmem:[#allocation5 + $0x60] sm:$0xff]  ;;  %v59_v4 = vld [vmem:[#allocation2] sm:$0xff]  ;;  %s257_s6 = sshll.u32 %s474_s5, 4  ;;  %s258_s6 = int_to_ptr.vmem [resolvable:$true] %s257_s6 }
  0x27   :  { %308 = vmatpush3.msra.mxu0 %v76_v0  ;;  %v72_v5 = vld [vmem:[#allocation5 + $0x58] sm:$0xff]  ;;  %339 = vmatprep.mubr.f32.mxu0 %v59_v4  ;;  %v166_v7 = vld [vmem:[#allocation7 + $0x70] sm:$0xff]  ;;  %v165_v9 = vld [vmem:[#allocation7 + $0x68] sm:$0xff]  ;;  %s443_s7 = scalar_lea.vmem %s258_s6, 256  ;;  %p448_p2 = scmp.lt.s32.totalorder %s258_s6, %s258_s6 }
  0x28   :  { %309 = vmatprep.subr.mxu0 %v75_v1  ;;  %v167_v6 = vld [vmem:[#allocation7 + $0x78] sm:$0xff]  ;;  %v71_v8 = vld [vmem:[#allocation5 + $0x50] sm:$0xff]  ;;  %v70_v10 = vld [vmem:[#allocation5 + $0x48] sm:$0xff]  ;;  %p444_p1 = scmp.ne.s32.totalorder %s258_s6, %s443_s7  ;;  %p449_p3 = scmp.lt.s32.totalorder %s443_s7, %s443_s7 }
  0x29   :  { %310 = vmatpush3.msra.mxu0 %v75_v1  ;;  %342 = vmatprep.subr.mxu1 %v167_v6  ;;  %v164_v11 = vld [vmem:[#allocation7 + $0x60] sm:$0xff]  ;;  %v163_v13 = vld [vmem:[#allocation7 + $0x58] sm:$0xff]  ;;  %v162_v15 = vld [vmem:[#allocation7 + $0x50] sm:$0xff] }
  0x2a   :  { %311 = vmatprep.subr.mxu0 %v74_v2  ;;  %343 = vmatpush3.msra.mxu1 %v167_v6  ;;  %v69_v12 = vld [vmem:[#allocation5 + $0x40] sm:$0xff]  ;;  %v68_v14 = vld [vmem:[#allocation5 + $0x38] sm:$0xff]  ;;  %v67_v16 = vld [vmem:[#allocation5 + $0x30] sm:$0xff]  ;;  %p450_p4 = por %p449_p3, %p448_p2 }
  0x2b   :  { %312 = vmatpush3.msra.mxu0 %v74_v2  ;;  %344 = vmatprep.subr.mxu1 %v166_v7  ;;  %v161_v17 = vld [vmem:[#allocation7 + $0x48] sm:$0xff]  ;;  %v160_v19 = vld [vmem:[#allocation7 + $0x40] sm:$0xff]  ;;  %v159_v21 = vld [vmem:[#allocation7 + $0x38] sm:$0xff] }
  0x2c   :  { %313 = vmatprep.subr.mxu0 %v73_v3  ;;  %345 = vmatpush3.msra.mxu1 %v166_v7  ;;  %v66_v18 = vld [vmem:[#allocation5 + $0x28] sm:$0xff]  ;;  %v65_v20 = vld [vmem:[#allocation5 + $0x20] sm:$0xff]  ;;  %v64_v22 = vld [vmem:[#allocation5 + $0x18] sm:$0xff]  ;;  %p451_p5 = pnand %p450_p4, %p444_p1 }
  0x2d   :  { %314 = vmatpush3.msra.mxu0 %v73_v3  ;;  %346 = vmatprep.subr.mxu1 %v165_v9  ;;  %v158_v23 = vld [vmem:[#allocation7 + $0x30] sm:$0xff]  ;;  %v157_v25 = vld [vmem:[#allocation7 + $0x28] sm:$0xff]  ;;  %v156_v27 = vld [vmem:[#allocation7 + $0x20] sm:$0xff] }
  0x2e   :  { %315 = vmatprep.subr.mxu0 %v72_v5  ;;  %347 = vmatpush3.msra.mxu1 %v165_v9  ;;  %v63_v24 = vld [vmem:[#allocation5 + $0x10] sm:$0xff]  ;;  %v62_v26 = vld [vmem:[#allocation5 + $0x8] sm:$0xff]  ;;  %v61_v28 = vld [vmem:[#allocation5] sm:$0xff] }
  0x2f   :  { %316 = vmatpush3.msra.mxu0 %v72_v5  ;;  %348 = vmatprep.subr.mxu1 %v164_v11  ;;  %v155_v29 = vld [vmem:[#allocation7 + $0x18] sm:$0xff]  ;;  %v154_v31 = vld [vmem:[#allocation7 + $0x10] sm:$0xff]  ;;  %v153_v32 = vld [vmem:[#allocation7 + $0x8] sm:$0xff] }
  0x30   :  { %317 = vmatprep.subr.mxu0 %v71_v8  ;;  %349 = vmatpush3.msra.mxu1 %v164_v11  ;;  %v60_v30 = vld [vmem:[#allocation2 + $0x8] sm:$0xff]  ;;  %v152_v33 = vld [vmem:[#allocation7] sm:$0xff]  ;;  %v270_v36 = vld [vmem:[%s530_s3] ss:$0 sm:$0xff] }
  0x31   :  { %318 = vmatpush3.msra.mxu0 %v71_v8  ;;  %350 = vmatprep.subr.mxu1 %v163_v13 }
  0x32   :  { %319 = vmatprep.subr.mxu0 %v70_v10  ;;  %351 = vmatpush3.msra.mxu1 %v163_v13 }
  0x33   :  { %320 = vmatpush3.msra.mxu0 %v70_v10  ;;  %352 = vmatprep.subr.mxu1 %v162_v15 }
  0x34   :  { %321 = vmatprep.subr.mxu0 %v69_v12  ;;  %353 = vmatpush3.msra.mxu1 %v162_v15 }
  0x35   :  { %322 = vmatpush3.msra.mxu0 %v69_v12  ;;  %354 = vmatprep.subr.mxu1 %v161_v17 }
  0x36   :  { %323 = vmatprep.subr.mxu0 %v68_v14  ;;  %355 = vmatpush3.msra.mxu1 %v161_v17 }
  0x37   :  { %324 = vmatpush3.msra.mxu0 %v68_v14  ;;  %356 = vmatprep.subr.mxu1 %v160_v19 }
  0x38   :  { %325 = vmatprep.subr.mxu0 %v67_v16  ;;  %357 = vmatpush3.msra.mxu1 %v160_v19 }
  0x39   :  { %326 = vmatpush3.msra.mxu0 %v67_v16  ;;  %358 = vmatprep.subr.mxu1 %v159_v21 }
  0x3a   :  { %327 = vmatprep.subr.mxu0 %v66_v18  ;;  %359 = vmatpush3.msra.mxu1 %v159_v21 }
  0x3b   :  { %328 = vmatpush3.msra.mxu0 %v66_v18  ;;  %360 = vmatprep.subr.mxu1 %v158_v23 }
  0x3c   :  { %329 = vmatprep.subr.mxu0 %v65_v20  ;;  %361 = vmatpush3.msra.mxu1 %v158_v23 }
  0x3d   :  { %330 = vmatpush3.msra.mxu0 %v65_v20  ;;  %362 = vmatprep.subr.mxu1 %v157_v25 }
  0x3e   :  { %331 = vmatprep.subr.mxu0 %v64_v22  ;;  %363 = vmatpush3.msra.mxu1 %v157_v25 }
  0x3f   :  { %332 = vmatpush3.msra.mxu0 %v64_v22  ;;  %364 = vmatprep.subr.mxu1 %v156_v27 }
  0x40   :  { %333 = vmatprep.subr.mxu0 %v63_v24  ;;  %365 = vmatpush3.msra.mxu1 %v156_v27 }
  0x41   :  { %334 = vmatpush3.msra.mxu0 %v63_v24  ;;  %366 = vmatprep.subr.mxu1 %v155_v29 }
  0x42   :  { %335 = vmatprep.subr.mxu0 %v62_v26  ;;  %367 = vmatpush3.msra.mxu1 %v155_v29 }
  0x43   :  { %336 = vmatpush3.msra.mxu0 %v62_v26  ;;  %368 = vmatprep.subr.mxu1 %v154_v31 }
  0x44   :  { %337 = vmatprep.subr.mxu0 %v61_v28  ;;  %369 = vmatpush3.msra.mxu1 %v154_v31 }
  0x45   :  { %338 = vmatpush3.msra.mxu0 %v61_v28  ;;  %370 = vmatprep.subr.mxu1 %v153_v32 }
  0x46   :  { %340 = vmatmul.mubr.f32.vlgmr.msra.gmra.mxu0 %v60_v30  ;;  %371 = vmatpush3.msra.mxu1 %v153_v32 }
  0x47   :  { %372 = vmatprep.subr.mxu1 %v152_v33 }
  0x48   :  { %373 = vmatpush3.msra.mxu1 %v152_v33 }
 0x106   :  { %v341_v34 = vpop.f32.mrf.mxu0 }
 0x108   :  { %v143_v35 = vpop.f32.mrf.mxu0 }
 0x109   :  { %374 = vmatprep.mubr.f32.mxu1 %v143_v35 }
 0x10a   :  { %375 = vmatmul.mubr.f32.vlgmr.msra.gmra.mxu1 %v341_v34 }
 0x1ca   :  { %v376_v37 = vpop.f32.mrf.mxu1 }
 0x1cb   :  { %v247_v38 = vadd.f32 %v376_v37, %v270_v36 }
 0x1cc   :  { %v241_v39 = vpop.f32.mrf.mxu1 }
 0x1cd   :  { %251 = vst [vmem:[#allocation8 + $0x8] sm:$0xff] %v247_v38  ;;  %v242_v40 = vadd.f32 %v270_v36, %v241_v39 }
 0x1cf   :  { %250 = vst [vmem:[#allocation8] sm:$0xff] %v242_v40 }
 0x1d0   :  { %454 = shalt.err (!%p451_p5)
}
 0x1d1   :  { %263 = dma.vmem_to_hbm [thread:$0]  %s258_s6, 256, %s531_s4, [#allocation4], %s471_s20, %s471_s20, %s472_s21  }
 0x1d2   :  { %467 = dma.done.wait [#allocation4], 256  }
 0x1d3   :  { %468 = vsyncadd [#allocation4], 4294967040 }
 0x1d4   :  { %267 = vsyncpa [#allocation3], 1 }
 0x1d5   :  { %268 = vsyncpa [#allocation6], 1 }
 0x1d6   :  { %269 = vsyncpa [#allocation4], 1 }

</bundles_post_ra>
